<compile_context>
chip_gen: v7x
topology: tpu7x:2x2x1
jax: 0.10.0
libtpu: 0.0.40
codegen_flags: <defaults>
</compile_context>

<pallas_src>
import functools

import numpy as np
import jax
import jax.numpy as jnp
from jax import lax
from jax.experimental import pallas as pl
from jax.experimental.pallas import tpu as pltpu

LANE = 128
INV_SQRT2 = float(1.0 / np.sqrt(2.0))


def _round_up(n, m):
    return ((n + m - 1) // m) * m


def _gelu_exact(y):
    # matches torch.nn.GELU() default (erf form)
    return 0.5 * y * (1.0 + lax.erf(y * INV_SQRT2))


@functools.lru_cache(maxsize=None)
def _vmem_limit_bytes():
    # Per-generation VMEM budget: 75% of the chip's VMEM (v5e/v6e: 128 MiB, v7x: 64 MiB),
    # capped at 96 MiB.  Conservative fallback if the query is unavailable.
    try:
        cap = int(getattr(pltpu.get_tpu_info(), "vmem_capacity_bytes", 0))
    except Exception:
        cap = 0
    if cap <= 0:
        cap = 64 * 1024 * 1024
    return min((cap * 3) // 4, 96 * 1024 * 1024)


def _pick_nt(coutp):
    # Lane-padded Cout tile.  Small Couts go in one block; big ones tile on 256/128 so the
    # n axis also provides parallel blocks for megacore sharding.
    if coutp <= 512:
        return coutp
    if coutp % 256 == 0:
        return 256
    return 128


# --------------------------------------------------------------------------------------
# Kernel 1: fused 3x3 conv over (possibly) multiple concatenated input groups
#           (+ folded BatchNorm + bias [+ exact GELU]).
#   grid = (batch, Cout tiles).  No K grid axis: all Cin (per input group) is reduced in one
#   pass, accumulating 9 flattened-M taps per group straight into a single f32 value.
# --------------------------------------------------------------------------------------
def _conv3x3_kernel(*refs, n_in, h_out, w_out, apply_gelu):
    x_refs = refs[:n_in]
    w_refs = refs[n_in:2 * n_in]
    b_ref = refs[2 * n_in]
    o_ref = refs[2 * n_in + 1]
    nt = o_ref.shape[-1]
    m = h_out * w_out

    acc = jnp.zeros((m, nt), jnp.float32)
    for x_ref, w_ref in zip(x_refs, w_refs):                 # static, unrolled (<=2 groups)
        ck = x_ref.shape[-1]
        for dy in range(3):                                  # static, unrolled
            for dx in range(3):
                lhs = x_ref[0, dy:dy + h_out, dx:dx + w_out, :].reshape(m, ck)
                acc = acc + jnp.dot(lhs, w_ref[dy, dx],
                                    preferred_element_type=jnp.float32)

    y = acc + b_ref[...]                                     # bias already holds BN shift
    if apply_gelu:
        y = _gelu_exact(y)
    o_ref[0] = y.reshape(h_out, w_out, nt).astype(o_ref.dtype)


def conv3x3_pallas(xs, ws, b, apply_gelu, pads=None):
    """xs: list of NHWC bf16 inputs (channels lane-padded to 128); ws: matching list of
    (3,3,Ck_pad,Coutp) bf16 weights; b: (1,Coutp) f32 bias (BN folded).  pads[i]=(dh,dw) is
    extra bottom/right zero pad for input i (folds the decoder's F.pad into the conv halo)."""
    n_in = len(xs)
    assert len(ws) == n_in
    if pads is None:
        pads = [(0, 0)] * n_in
    hs = [x.shape[1] + p[0] for x, p in zip(xs, pads)]
    ws_sp = [x.shape[2] + p[1] for x, p in zip(xs, pads)]
    h_out, w_out = hs[0], ws_sp[0]
    assert all(h == h_out for h in hs) and all(w == w_out for w in ws_sp)
    B = xs[0].shape[0]
    coutp = ws[0].shape[-1]
    nt = _pick_nt(coutp)

    # Single 1-px halo pad (absorbs F.pad right/bottom as well).  No row stack, no concat.
    xps = [jnp.pad(x, ((0, 0), (1, 1 + p[0]), (1, 1 + p[1]), (0, 0)))
           for x, p in zip(xs, pads)]

    in_specs = []
    for xp in xps:
        in_specs.append(pl.BlockSpec((1,) + xp.shape[1:], lambda bb, nn: (bb, 0, 0, 0)))
    for w in ws:
        in_specs.append(pl.BlockSpec((3, 3, w.shape[2], nt), lambda bb, nn: (0, 0, 0, nn)))
    in_specs.append(pl.BlockSpec((1, nt), lambda bb, nn: (0, nn)))

    cin_total = sum(w.shape[2] for w in ws)
    out = pl.pallas_call(
        functools.partial(_conv3x3_kernel, n_in=n_in, h_out=h_out, w_out=w_out,
                          apply_gelu=apply_gelu),
        out_shape=jax.ShapeDtypeStruct((B, h_out, w_out, coutp), xs[0].dtype),
        grid=(B, coutp // nt),
        in_specs=in_specs,
        out_specs=pl.BlockSpec((1, h_out, w_out, nt), lambda bb, nn: (bb, 0, 0, nn)),
        compiler_params=pltpu.CompilerParams(
            dimension_semantics=("parallel", "parallel"),
            vmem_limit_bytes=_vmem_limit_bytes()),
        cost_estimate=pl.CostEstimate(
            flops=2 * B * h_out * w_out * 9 * cin_total * coutp,
            transcendentals=B * h_out * w_out * coutp if apply_gelu else 0,
            bytes_accessed=sum(int(x.size) for x in xps) * 2
                           + sum(int(w.size) for w in ws) * 2
                           + int(b.size) * 4 + B * h_out * w_out * coutp * 2),
    )(*xps, *ws, b)
    return out


# --------------------------------------------------------------------------------------
# Kernel 2: ConvTranspose2d with kernel_size == stride == s (+ bias).
#   grid = (batch, row-groups).  One GEMM with M = rows*W over the full Cin; the weight
#   columns are ordered (ky, kx, cout) so the output lands already pixel-shuffled in a
#   (B, H, s, W, s*Coutp) array -> the final NHWC layout is a free reshape.
# --------------------------------------------------------------------------------------
def _deconv_kernel(x_ref, w_ref, b_ref, o_ref, *, s, coutp, rh, w_in):
    cin = x_ref.shape[-1]
    lhs = x_ref[0].reshape(rh * w_in, cin)
    y = jnp.dot(lhs, w_ref[...], preferred_element_type=jnp.float32) + b_ref[...]
    y = y.reshape(rh, w_in, s * s * coutp)
    for ky in range(s):                                      # static, lane-aligned slices
        o_ref[0, :, ky, :, :] = y[:, :, ky * s * coutp:(ky + 1) * s * coutp].astype(o_ref.dtype)


def deconv_pallas(x, w, b, s):
    """x: (B,H,W,Cinp) bf16;  w: (Cinp, s*s*Coutp) bf16;  b: (1, s*s*Coutp) f32."""
    B, H, W, Cin = x.shape
    sscout = w.shape[1]
    coutp = sscout // (s * s)

    # Row-group size: biggest divisor of H whose f32 GEMM result stays under ~8 MiB.
    rh = 1
    for d in range(H, 0, -1):
        if H % d == 0 and d * W * sscout * 4 <= 8 * 1024 * 1024:
            rh = d
            break

    out = pl.pallas_call(
        functools.partial(_deconv_kernel, s=s, coutp=coutp, rh=rh, w_in=W),
        out_shape=jax.ShapeDtypeStruct((B, H, s, W, s * coutp), x.dtype),
        grid=(B, H // rh),
        in_specs=[
            pl.BlockSpec((1, rh, W, Cin), lambda bb, r: (bb, r, 0, 0)),
            pl.BlockSpec((Cin, sscout), lambda bb, r: (0, 0)),
            pl.BlockSpec((1, sscout), lambda bb, r: (0, 0)),
        ],
        out_specs=pl.BlockSpec((1, rh, s, W, s * coutp), lambda bb, r: (bb, r, 0, 0, 0)),
        compiler_params=pltpu.CompilerParams(
            dimension_semantics=("parallel", "parallel"),
            vmem_limit_bytes=_vmem_limit_bytes()),
        cost_estimate=pl.CostEstimate(
            flops=2 * B * H * W * Cin * sscout, transcendentals=0,
            bytes_accessed=int(x.size) * 2 + int(w.size) * 2 + int(b.size) * 4
                           + B * H * W * sscout * 2),
    )(x, w, b)
    # (B, H, s, W, s*Coutp) -> (B, H*s, W*s, Coutp): pure reshape, no HBM transpose pass.
    return out.reshape(B, H * s, W * s, coutp)


# --------------------------------------------------------------------------------------
# Pure-JAX references (same bf16-input / f32-accumulate math, no Pallas)
# --------------------------------------------------------------------------------------
def conv3x3_ref(xs, ws, b, apply_gelu, pads=None):
    n_in = len(xs)
    if pads is None:
        pads = [(0, 0)] * n_in
    B = xs[0].shape[0]
    H = xs[0].shape[1] + pads[0][0]
    W = xs[0].shape[2] + pads[0][1]
    coutp = ws[0].shape[-1]
    acc = jnp.zeros((B, H, W, coutp), jnp.float32)
    for x, w, (dh, dw) in zip(xs, ws, pads):
        xp = jnp.pad(x, ((0, 0), (1, 1 + dh), (1, 1 + dw), (0, 0)))
        for dy in range(3):
            for dx in range(3):
                acc = acc + jnp.einsum('bhwc,cn->bhwn', xp[:, dy:dy + H, dx:dx + W],
                                       w[dy, dx], preferred_element_type=jnp.float32)
    y = acc + b.reshape(1, 1, 1, coutp)
    if apply_gelu:
        y = _gelu_exact(y)
    return y.astype(xs[0].dtype)


def deconv_ref(x, w, b, s):
    B, H, W, _ = x.shape
    coutp = w.shape[1] // (s * s)
    y = jnp.einsum('bhwc,ck->bhwk', x, w, preferred_element_type=jnp.float32)
    y = y + b.reshape(1, 1, 1, -1)
    y = y.reshape(B, H, W, s, s, coutp).transpose(0, 1, 3, 2, 4, 5)
    return y.reshape(B, H * s, W * s, coutp).astype(x.dtype)


PALLAS_OPS = {"conv": conv3x3_pallas, "deconv": deconv_pallas}
REF_OPS = {"conv": conv3x3_ref, "deconv": deconv_ref}


# --------------------------------------------------------------------------------------
# Decoder forward (layout glue in plain JAX, compute in the two fused kernels above)
# --------------------------------------------------------------------------------------
def convnext_decoder_forward(params, x, compressed_features, ops):
    for i, feats in enumerate(compressed_features):
        up = params["up"][i]
        x = ops["deconv"](x, up["w"], up["b"], up["s"])
        dh = feats.shape[1] - x.shape[1]
        dw = feats.shape[2] - x.shape[2]
        dec = params["dec"][i]
        # conv1: F.pad folded into x's halo pad, channel concat folded into the reduction
        # (two lhs inputs, two weight slabs, one accumulator) -> no HBM concat.
        x = ops["conv"]([x, feats], dec["conv1_w"], dec["conv1_b"], True,
                        pads=[(dh, dw), (0, 0)])
        x = ops["conv"]([x], dec["conv2_w"], dec["conv2_b"], False)
    fu = params["final_up"]
    x = ops["deconv"](x, fu["w"], fu["b"], fu["s"])
    fd = params["final_dec"]
    x = ops["conv"]([x], fd["conv1_w"], fd["conv1_b"], True)
    x = ops["conv"]([x], fd["conv2_w"], fd["conv2_b"], False)
    return x


# --------------------------------------------------------------------------------------
# Synthetic PyTorch-layout parameters + conversion to padded bf16 GEMM layouts
# --------------------------------------------------------------------------------------
def _conv_torch(key, cin, cout, k=3):
    kw, kb = jax.random.split(key)
    w = jax.random.normal(kw, (cout, cin, k, k), jnp.float32) / np.sqrt(cin * k * k)
    b = jax.random.normal(kb, (cout,), jnp.float32) * 0.1
    return w, b


def _deconv_torch(key, cin, cout, k):
    kw, kb = jax.random.split(key)
    w = jax.random.normal(kw, (cin, cout, k, k), jnp.float32) / np.sqrt(cin * k * k)
    b = jax.random.normal(kb, (cout,), jnp.float32) * 0.1
    return w, b


def _bn_affine(key, c, eps=1e-5):
    # TODO(synk): BatchNorm2d in eval mode only (running stats folded into an affine map).
    k1, k2, k3, k4 = jax.random.split(key, 4)
    gamma = 1.0 + 0.1 * jax.random.normal(k1, (c,), jnp.float32)
    beta = 0.1 * jax.random.normal(k2, (c,), jnp.float32)
    mean = 0.1 * jax.random.normal(k3, (c,), jnp.float32)
    var = 1.0 + 0.1 * jnp.abs(jax.random.normal(k4, (c,), jnp.float32))
    scale = gamma / jnp.sqrt(var + eps)
    shift = beta - mean * scale
    return scale, shift


def _convert_conv(w_t, b, in_groups, scale=None, shift=None):
    """torch (Cout,Cin,3,3) -> list of lane-padded (3,3,Ck_pad,Coutp) bf16 weight slabs
    (one per concatenated input group, matching torch.cat channel order) + a single
    (1,Coutp) f32 bias.  BN scale/shift are folded in."""
    cout = w_t.shape[0]
    coutp = _round_up(cout, LANE)
    w = jnp.transpose(w_t, (2, 3, 1, 0))                     # (3,3,Cin,Cout)
    if scale is not None:
        w = w * scale[None, None, None, :]
        b = b * scale + shift
    parts, off = [], 0
    for true_c, pad_c in in_groups:
        blk = w[:, :, off:off + true_c, :]
        blk = jnp.pad(blk, ((0, 0), (0, 0), (0, pad_c - true_c), (0, coutp - cout)))
        parts.append(blk.astype(jnp.bfloat16))
        off += true_c
    b = jnp.pad(b, (0, coutp - cout)).reshape(1, coutp).astype(jnp.float32)
    return parts, b


def _convert_deconv(w_t, b, s):
    """torch (Cin,Cout,s,s) -> (Cinp, s*s*Coutp) bf16 with columns ordered (ky,kx,cout)
    so the kernel's output is already pixel-shuffled, + tiled (1, s*s*Coutp) f32 bias."""
    cin, cout = w_t.shape[0], w_t.shape[1]
    cinp, coutp = _round_up(cin, LANE), _round_up(cout, LANE)
    w = jnp.transpose(w_t, (0, 2, 3, 1))                     # (Cin, ky, kx, Cout)
    w = jnp.pad(w, ((0, cinp - cin), (0, 0), (0, 0), (0, coutp - cout)))
    w = w.reshape(cinp, s * s * coutp)
    bt = jnp.tile(jnp.pad(b, (0, coutp - cout)), s * s).reshape(1, s * s * coutp)
    return w.astype(jnp.bfloat16), bt.astype(jnp.float32)


def _block_params(key, in_groups, cin, cout):
    k1, k2, k3 = jax.random.split(key, 3)
    w1, b1 = _conv_torch(k1, cin, cout)
    scale, shift = _bn_affine(k2, cout)
    w2, b2 = _conv_torch(k3, cout, cout)
    c1w, c1b = _convert_conv(w1, b1, in_groups, scale, shift)
    c2w, c2b = _convert_conv(w2, b2, [(cout, _round_up(cout, LANE))])
    return {"conv1_w": c1w, "conv1_b": c1b, "conv2_w": c2w, "conv2_b": c2b}


def init_decoder_params(key, dims):
    params = {"up": [], "dec": []}
    for i in range(len(dims) - 1):
        key, k1, k2 = jax.random.split(key, 3)
        wt, bt = _deconv_torch(k1, dims[i], dims[i + 1], 2)
        w, b = _convert_deconv(wt, bt, 2)
        params["up"].append({"w": w, "b": b, "s": 2})
        cfeat = dims[i] - dims[i + 1]
        in_groups = [(dims[i + 1], _round_up(dims[i + 1], LANE)),
                     (cfeat, _round_up(cfeat, LANE))]
        params["dec"].append(_block_params(k2, in_groups, dims[i], dims[i + 1]))
    key, k1, k2 = jax.random.split(key, 3)
    wt, bt = _deconv_torch(k1, dims[-1], dims[-1], 4)
    w, b = _convert_deconv(wt, bt, 4)
    params["final_up"] = {"w": w, "b": b, "s": 4}
    params["final_dec"] = _block_params(
        k2, [(dims[-1], _round_up(dims[-1], LANE))], dims[-1], dims[-1])
    return params


# --------------------------------------------------------------------------------------
if __name__ == "__main__":
    key = jax.random.PRNGKey(0)
    dims = [64, 32, 16, 8]          # small stand-in for the real [768, 384, 192, 96]
    B, H0, W0 = 2, 2, 2

    kx, kf0, kf1, kf2, kp = jax.random.split(key, 5)

    def _pad_c(a):   # NHWC, bf16 activations, channels zero-padded to the 128-lane boundary
        c = a.shape[-1]
        return jnp.pad(a, ((0, 0),) * 3 + ((0, _round_up(c, LANE) - c),)).astype(jnp.bfloat16)

    x = _pad_c(jax.random.normal(kx, (B, H0, W0, dims[0]), jnp.float32))
    compressed_features = [
        _pad_c(jax.random.normal(kf0, (B, 4, 4, dims[0] - dims[1]), jnp.float32)),
        _pad_c(jax.random.normal(kf1, (B, 8, 8, dims[1] - dims[2]), jnp.float32)),
        _pad_c(jax.random.normal(kf2, (B, 16, 16, dims[2] - dims[3]), jnp.float32)),
    ]
    params = init_decoder_params(kp, dims)

    out = convnext_decoder_forward(params, x, compressed_features, PALLAS_OPS)
    out = jax.block_until_ready(out)[..., :dims[-1]]        # drop lane padding at the end

    ref = convnext_decoder_forward(params, x, compressed_features, REF_OPS)
    ref = jax.block_until_ready(ref)[..., :dims[-1]]

    assert out.shape == (B, 64, 64, dims[-1]), out.shape
    out32 = np.asarray(jnp.asarray(out, jnp.float32))
    ref32 = np.asarray(jnp.asarray(ref, jnp.float32))
    # bf16 MXU inputs + bf16 activations: compare against the matching-precision JAX
    # reference with a bf16-appropriate tolerance.
    if not np.allclose(out32, ref32, rtol=2e-2, atol=2e-2):
        raise SystemExit("Pallas result mismatch vs JAX reference")
    print("KERNEL_OK")
</pallas_src>

<mosaic_0001>
module attributes {stable_mosaic.version = 11 : i64} {
  func.func @_deconv_kernel(%arg0: i32, %arg1: i32, %arg2: memref<1x2x2x128xbf16, #tpu.memory_space<vmem>>, %arg3: memref<128x512xbf16, #tpu.memory_space<vmem>>, %arg4: memref<1x512xf32, #tpu.memory_space<vmem>>, %arg5: memref<1x2x2x2x256xbf16, #tpu.memory_space<vmem>>) attributes {dimension_semantics = [#tpu.dimension_semantics<parallel>, #tpu.dimension_semantics<parallel>], iteration_bounds = array<i64: 2, 1>, scalar_prefetch = 0 : i64, scratch_operands = 0 : i64, tpu.core_type = #tpu.core_type<tc>, window_params = [{transform_indices = @transform_0, window_bounds = array<i64: 1, 2, 2, 128>}, {pipeline_mode = #tpu.pipeline_mode<synchronous>, transform_indices = @transform_1, window_bounds = array<i64: 128, 512>}, {pipeline_mode = #tpu.pipeline_mode<synchronous>, transform_indices = @transform_2, window_bounds = array<i64: 1, 512>}, {transform_indices = @transform_3, window_bounds = array<i64: 1, 2, 2, 2, 256>}]} {
    %c0 = arith.constant 0 : index
    %c0_0 = arith.constant 0 : index
    %c0_1 = arith.constant 0 : index
    %c0_2 = arith.constant 0 : index
    %0 = vector.load %arg2[%c0, %c0_0, %c0_1, %c0_2] : memref<1x2x2x128xbf16, #tpu.memory_space<vmem>>, vector<1x2x2x128xbf16>
    %1 = vector.shape_cast %0 : vector<1x2x2x128xbf16> to vector<2x2x128xbf16>
    %2 = vector.shape_cast %1 : vector<2x2x128xbf16> to vector<4x128xbf16>
    %c0_3 = arith.constant 0 : index
    %c0_4 = arith.constant 0 : index
    %3 = vector.load %arg3[%c0_3, %c0_4] : memref<128x512xbf16, #tpu.memory_space<vmem>>, vector<128x512xbf16>
    %cst = arith.constant dense<0.000000e+00> : vector<4x512xf32>
    %4 = tpu.matmul %2, %3, %cst {dimension_numbers = #tpu.dot_dimension_numbers<[1], [0], [0], [1], [0, 0, 1, 1], [], []>} : vector<4x128xbf16>, vector<128x512xbf16>, vector<4x512xf32> -> vector<4x512xf32>
    %c0_5 = arith.constant 0 : index
    %c0_6 = arith.constant 0 : index
    %5 = vector.load %arg4[%c0_5, %c0_6] : memref<1x512xf32, #tpu.memory_space<vmem>>, vector<1x512xf32>
    %6 = vector.broadcast %5 : vector<1x512xf32> to vector<4x512xf32>
    %7 = arith.addf %4, %6 : vector<4x512xf32>
    %8 = vector.shape_cast %7 : vector<4x512xf32> to vector<2x2x512xf32>
    %9 = vector.extract_strided_slice %8 {offsets = [0, 0, 0], sizes = [2, 2, 256], strides = [1, 1, 1]} : vector<2x2x512xf32> to vector<2x2x256xf32>
    %10 = arith.truncf %9 : vector<2x2x256xf32> to vector<2x2x256xbf16>
    %c0_7 = arith.constant 0 : index
    %c0_8 = arith.constant 0 : index
    %c0_9 = arith.constant 0 : index
    %c0_10 = arith.constant 0 : index
    %c0_11 = arith.constant 0 : index
    %11 = vector.load %arg5[%c0_7, %c0_8, %c0_9, %c0_10, %c0_11] : memref<1x2x2x2x256xbf16, #tpu.memory_space<vmem>>, vector<1x2x1x2x256xbf16>
    %12 = vector.shape_cast %11 : vector<1x2x1x2x256xbf16> to vector<2x2x256xbf16>
    %13 = vector.shape_cast %10 : vector<2x2x256xbf16> to vector<1x2x1x2x256xbf16>
    tpu.vector_store %arg5[%c0_7, %c0_8, %c0_9, %c0_10, %c0_11], %13 {strides = array<i32>} : memref<1x2x2x2x256xbf16, #tpu.memory_space<vmem>>, vector<1x2x1x2x256xbf16>,
    %14 = vector.extract_strided_slice %8 {offsets = [0, 0, 256], sizes = [2, 2, 256], strides = [1, 1, 1]} : vector<2x2x512xf32> to vector<2x2x256xf32>
    %15 = arith.truncf %14 : vector<2x2x256xf32> to vector<2x2x256xbf16>
    %c0_12 = arith.constant 0 : index
    %c0_13 = arith.constant 0 : index
    %c1 = arith.constant 1 : index
    %c0_14 = arith.constant 0 : index
    %c0_15 = arith.constant 0 : index
    %16 = vector.load %arg5[%c0_12, %c0_13, %c1, %c0_14, %c0_15] : memref<1x2x2x2x256xbf16, #tpu.memory_space<vmem>>, vector<1x2x1x2x256xbf16>
    %17 = vector.shape_cast %16 : vector<1x2x1x2x256xbf16> to vector<2x2x256xbf16>
    %18 = vector.shape_cast %15 : vector<2x2x256xbf16> to vector<1x2x1x2x256xbf16>
    tpu.vector_store %arg5[%c0_12, %c0_13, %c1, %c0_14, %c0_15], %18 {strides = array<i32>} : memref<1x2x2x2x256xbf16, #tpu.memory_space<vmem>>, vector<1x2x1x2x256xbf16>,
    return
  }
  func.func @transform_0(%arg0: i32, %arg1: i32) -> (i32, i32, i32, i32) {
    %c0_i32 = arith.constant 0 : i32
    %c0_i32_0 = arith.constant 0 : i32
    %c0_i32_1 = arith.constant 0 : i32
    return %arg0, %arg1, %c0_i32, %c0_i32_0 : i32, i32, i32, i32
  }
  func.func @transform_1(%arg0: i32, %arg1: i32) -> (i32, i32) {
    %c0_i32 = arith.constant 0 : i32
    %c0_i32_0 = arith.constant 0 : i32
    %c0_i32_1 = arith.constant 0 : i32
    return %c0_i32, %c0_i32_0 : i32, i32
  }
  func.func @transform_2(%arg0: i32, %arg1: i32) -> (i32, i32) {
    %c0_i32 = arith.constant 0 : i32
    %c0_i32_0 = arith.constant 0 : i32
    %c0_i32_1 = arith.constant 0 : i32
    return %c0_i32, %c0_i32_0 : i32, i32
  }
  func.func @transform_3(%arg0: i32, %arg1: i32) -> (i32, i32, i32, i32, i32) {
    %c0_i32 = arith.constant 0 : i32
    %c0_i32_0 = arith.constant 0 : i32
    %c0_i32_1 = arith.constant 0 : i32
    %c0_i32_2 = arith.constant 0 : i32
    return %arg0, %arg1, %c0_i32, %c0_i32_0, %c0_i32_1 : i32, i32, i32, i32, i32
  }
}

</mosaic_0001>

<bundles_post_ra>
// kernel: tpu_custom_call.1
= control target key start
LH: loop header
LB: loop body
LE: loop exit
PB: predicated region body
PF: predicated region fallthrough
CT: control target
= control target key end

     0   :  { %8 = vsyncpa [#allocation3], 0  ;;  %s1411_s0 = inlined_call_operand.hbm [shape: bf16[2,2,2,128], index: 0, kind: input, shape index: {}]   ;;  %s1412_s1 = inlined_call_operand.hbm [shape: bf16[128,512], index: 1, kind: input, shape index: {}]   ;;  %s1413_s2 = inlined_call_operand.vmem [shape: f32[1,512], index: 2, kind: input, shape index: {}]   ;;  %s1414_s3 = inlined_call_operand.hbm [shape: bf16[2,2,2,2,256], index: 3, kind: output, shape index: {}]  }
   0x1   :  { %10 = vsyncpa [#allocation3 + $0x1], 0 }
   0x2   :  { %11 = vsyncpa [#allocation6], 0 }
   0x3   :  { %12 = vsyncpa [#allocation4], 0 }
   0x4   :  { %14 = vsyncpa [#allocation4 + $0x1], 0  ;;  %s1173_s12 = smov 0   ;;  %s1175_s13 = smov 0  }
   0x5   :  { %s1177_s14 = smov 0   ;;  %s1179_s15 = smov 0  }
   0x6   :  { %s1181_s16 = smov 0   ;;  %s1183_s17 = smov 0  }
   0x7 LB: > { %s804_s18 = sadd.s32 4294967295, %s1140_s17   ;;  %s805_s19 = sadd.s32 4294967294, %s1140_s17   ;;  %s1140_s17 = sphi %s1183_s17, %s20_s17   ;;  %s1136_s16 = sphi %s1181_s16, %s1438_s16   ;;  %s1132_s15 = sphi %s1179_s15, %s1437_s15   ;;  %s1128_s14 = sphi %s1177_s14, %s1436_s14   ;;  %s1124_s13 = sphi %s1175_s13, %s1435_s13   ;;  %s1120_s12 = sphi %s1173_s12, %s1434_s12  }
   0x8   : > { %p54_p0 = scmp.ne.s32.totalorder %s1124_s13, %s1120_s12  ;;  %p1207_p1 = scmp.eq.s32.totalorder %s804_s18, 0 }
   0x9   : > { %p1211_p2 = scmp.eq.s32.totalorder %s804_s18, 1  ;;  %p128_p3 = scmp.eq.s32.totalorder %s805_s19, 1 }
   0xa   : > { %s1419_s20 = scalar_select %p1207_p1, 1, 0 }
   0xb   : > { %s1420_s21 = scalar_select %p1211_p2, 1, 0 }
   0xc   : > { %p1217_p4 = por %p1207_p1, %p54_p0  ;;  %p806_p5 = scmp.ge.s32.totalorder %s1140_s17, 1 }
   0xd   : > { %p1222_p6 = por %p128_p3, %p54_p0  ;;  %p135_p7 = scmp.lt.s32.totalorder %s1140_s17, 3 }
   0xe   : > { %s1421_s22 = scalar_select %p1217_p4, 1, 0 }
   0xf   : > { %s1422_s23 = scalar_select %p1222_p6, 1, 0 }
  0x10   : > { %p1227_p8 = pnand %p806_p5, %p135_p7  ;;  %s1142_s25 = smov [#allocation5]  }
  0x11   : > { %s147_s26 = sshll.u32 %s1142_s25, 4  ;;  %s32_s28 = sadd.s32 1, %s1136_s16  ;;  %s148_s26 = int_to_ptr.vmem [resolvable:$true] %s147_s26 }
  0x12   : > { %s1423_s24 = scalar_select %p1227_p8, 1, 0 }
  0x13   : > { %p875_p9 = pneg %p1227_p8  ;;  %s996_s4 = scalar_lea.hbm %s1412_s1, 4096 }
  0x14   : > { %p997_p12 = scmp.ne.s32.totalorder %s1412_s1, %s996_s4  ;;  %p1003_p5 = scmp.lt.u32.totalorder %s996_s4, %s1412_s1 }
  0x15   : > { %p1236_p11 = pnand %p875_p9, %p1207_p1 }
  0x17   : > { %p998_p13 = pneg %p1236_p11 }
  0x19   : > { %p999_p0 = pnand %p998_p13, %p997_p12 }
  0x1b   : > { %p1000_p3 = pneg %p999_p0 }
  0x1d   : > { %p1005_p7 = pnand %p1003_p5, %p1000_p3 }
  0x1f   : > { %1008 = shalt.err (!%p1005_p7)
}
  0x20   : > { %s1009_s9 = scalar_lea.vmem %s148_s26, 4096  ;;  %p1017_p1 = scmp.lt.s32.totalorder %s148_s26, %s148_s26 }
  0x21   : > { %p1010_p9 = scmp.ne.s32.totalorder %s148_s26, %s1009_s9  ;;  %p1018_p4 = scmp.lt.s32.totalorder %s1009_s9, %s1009_s9 }
  0x23   : > { %p1012_p10 = pnand %p1010_p9, %p998_p13  ;;  %p1019_p8 = por %p1018_p4, %p1017_p1 }
  0x25   : > { %p1013_p6 = pneg %p1012_p10 }
  0x27   : > { %p1020_p2 = pnand %p1019_p8, %p1013_p6 }
  0x29   : > { %1023 = shalt.err (!%p1020_p2)
}
  0x2a   : > { %s1143_s10 = smov 256   ;;  %s1144_s11 = smov 16  }
  0x2b   : > { %878 = dma.hbm_to_vmem [thread:$0]  (!%p1236_p11), %s1412_s1, 4096, %s148_s26, [#allocation6], %s1143_s10, %s1143_s10, %s1144_s11  }
  0x2c   : > { %p34_p1 = scmp.ge.s32.totalorder %s32_s28, 2  ;;  %s41_s25 = sadd.s32 1, %s1128_s14 }
  0x2d   : > { %p48_p2 = scmp.ne.s32.totalorder %s1128_s14, %s1124_s13  ;;  %p49_p4 = scmp.eq.s32.totalorder %s1140_s17, 0 }
  0x2e   : > { %s1440_s28 = smov (%p34_p1, %s32_s28), 0  ;;  %p1426_p8 = scmp.ne.s32.totalorder %s1420_s21, 0 }
  0x2f   : > { %p1264_p6 = por %p49_p4, %p48_p2  ;;  %s36_s30 = ssub.s32 %s1136_s16, %s1440_s28 }
  0x30   : > { %p1270_p10 = por %p1426_p8, %p48_p2  ;;  %p888_p12 = scmp.lt.s32.totalorder %s1140_s17, 2 }
  0x31   : > { %p39_p11 = scmp.eq.s32.totalorder %s36_s30, 0  ;;  %s164_s26 = sand.u32 1, %s1128_s14  }
  0x32   : > { %s809_s4 = sshll.u32 %s164_s26, 1  ;;  %s863_s6 = sshll.u32 %s1136_s16, 5 }
  0x33   : > { %s1279_s5 = scalar_select %p39_p11, %s1128_s14, %s41_s25  }
  0x34   : > { %s1285_s9 = scalar_lea.hbm %s1411_s0, %s863_s6  ;;  %s168_s21 = scalar_lea.vmem [#allocation2], %s809_s4 }
  0x35   : > { %s177_s10 = sshll.u32 %s168_s21, 4  ;;  %p1291_p13 = pnand %p888_p12, %p1264_p6  ;;  %s1287_s10 = int_to_ptr.vmem [resolvable:$true] %s177_s10 }
  0x36   : > { %s1295_s19 = scalar_lea.sflag [#allocation3], %s164_s26  ;;  %s1024_s25 = scalar_lea.hbm %s1285_s9, 32 }
  0x37   : > { %p1025_p0 = scmp.ne.s32.totalorder %s1285_s9, %s1024_s25  ;;  %p1026_p3 = pneg %p1291_p13 }
  0x38   : > { %s1029_s29 = scalar_lea.hbm %s1411_s0, 64  ;;  %p1030_p9 = scmp.lt.u32.totalorder %s1285_s9, %s1411_s0 }
  0x39   : > { %p1027_p5 = pnand %p1026_p3, %p1025_p0  ;;  %p1031_p1 = scmp.lt.u32.totalorder %s1029_s29, %s1024_s25 }
  0x3a   : > { %p1033_p4 = scmp.lt.u32.totalorder %s1024_s25, %s1285_s9 }
  0x3b   : > { %p1028_p7 = pneg %p1027_p5  ;;  %p1032_p2 = por %p1031_p1, %p1030_p9 }
  0x3d   : > { %p1034_p6 = por %p1033_p4, %p1032_p2 }
  0x3f   : > { %p1035_p8 = pnand %p1034_p6, %p1028_p7 }
  0x41   : > { %1038 = shalt.err (!%p1035_p8)
}
  0x42   : > { %s1039_s26 = scalar_lea.vmem %s1287_s10, 32  ;;  %s1145_s8 = smov [#allocation2]  }
  0x43   : > { %p1040_p12 = scmp.ne.s32.totalorder %s1287_s10, %s1039_s26  ;;  %s1044_s21 = sshll.u32 %s1145_s8, 4  ;;  %s1045_s21 = int_to_ptr.vmem [resolvable:$false] %s1044_s21 }
  0x44   : > { %s1046_s30 = scalar_lea.vmem %s1045_s21, 64  ;;  %p1047_p5 = scmp.lt.s32.totalorder %s1287_s10, %s1045_s21 }
  0x45   : > { %p1042_p11 = pnand %p1040_p12, %p1026_p3  ;;  %p1048_p9 = scmp.lt.s32.totalorder %s1046_s30, %s1039_s26 }
  0x47   : > { %p1043_p0 = pneg %p1042_p11  ;;  %p1049_p1 = por %p1048_p9, %p1047_p5 }
  0x49   : > { %p1050_p2 = pnand %p1049_p1, %p1043_p0 }
  0x4b   : > { %1053 = shalt.err (!%p1050_p2)
}
  0x4c   : > { %s1146_s25 = smov 1   ;;  %p1429_p3 = scmp.ne.s32.totalorder %s1423_s24, 0 }
  0x4d   : > { %882 = dma.hbm_to_vmem [thread:$0]  (!%p1291_p13), %s1285_s9, 32, %s1287_s10, %s1295_s19, %s1144_s11, %s1144_s11, %s1146_s25  }
  0x4e   : > { %189 = sbr.rel (%p1429_p3) target bundleno = 370 (0x172), region = 32  ;;  %s1328_s4 = sand.u32 (!%p1429_p3), 1, %s1124_s13  }
  0x4f   : > { %s813_s29 = sshll.u32 (!%p1429_p3), %s1328_s4, 1  ;;  %s192_s6 = scalar_lea.sflag (!%p1429_p3), [#allocation3], %s1328_s4 }
  0x50   : > { %s1332_s7 = scalar_lea.vmem (!%p1429_p3), [#allocation2], %s813_s29  ;;  %p1430_p7 = scmp.ne.s32.totalorder (!%p1429_p3), %s1421_s22, 0 }
  0x55   : > { %1107 = dma.done.wait (%p1430_p7), %s192_s6, 32  }
  0x56   : > { %1109 = vsyncadd (%p1430_p7), %s192_s6, 4294967264  ;;  %p1431_p13 = scmp.ne.s32.totalorder %s1419_s20, 0 }
  0x58   : > { %1111 = dma.done.wait (%p1431_p13), [#allocation6], 4096  }
  0x59   : > { %1113 = vsyncadd (%p1431_p13), [#allocation6], 4294963200  ;;  %v1147_v0 = vmov 0   ;;  %v948_v1 = vld [vmem:[#allocation5 + $0x4] ss:$16 sps:$4 sm:$0xff]   ;;  %v261_v21 = vlaneseq  ;;  %s815_s24 = sshll.u32 %s1328_s4, 3 }
  0x5a   : > { %491 = vmatprep.mubr.bf16.mxu0 %v1147_v0  ;;  %532 = vmatprep.mubr.bf16.mxu1 %v1147_v0  ;;  %v950_v2 = vld [vmem:[#allocation5 + $0xc] ss:$16 sps:$4 sm:$0xff]   ;;  %v952_v3 = vld [vmem:[#allocation5] ss:$16 sps:$4 sm:$0xff]   ;;  %v953_v4 = vld [vmem:[#allocation5 + $0x8] ss:$16 sps:$4 sm:$0xff]  }
  0x5b   : > { %459 = vmatprep.subr.bf16.mxu0 %v948_v1  ;;  %500 = vmatprep.subr.bf16.mxu1 %v950_v2  ;;  %v954_v5 = vld [vmem:[#allocation5 + $0x24] ss:$16 sps:$4 sm:$0xff]   ;;  %v956_v6 = vld [vmem:[#allocation5 + $0x2c] ss:$16 sps:$4 sm:$0xff]   ;;  %v958_v7 = vld [vmem:[#allocation5 + $0x20] ss:$16 sps:$4 sm:$0xff]  }
  0x5c   : > { %460 = vmatpush1.bf16.msra.mxu0 %v952_v3  ;;  %501 = vmatpush1.bf16.msra.mxu1 %v953_v4  ;;  %v959_v8 = vld [vmem:[#allocation5 + $0x28] ss:$16 sps:$4 sm:$0xff]   ;;  %v960_v9 = vld [vmem:[#allocation5 + $0x44] ss:$16 sps:$4 sm:$0xff]   ;;  %v962_v10 = vld [vmem:[#allocation5 + $0x4c] ss:$16 sps:$4 sm:$0xff]  }
  0x5d   : > { %461 = vmatprep.subr.bf16.mxu0 %v954_v5  ;;  %502 = vmatprep.subr.bf16.mxu1 %v956_v6  ;;  %v964_v11 = vld [vmem:[#allocation5 + $0x40] ss:$16 sps:$4 sm:$0xff]   ;;  %v965_v12 = vld [vmem:[#allocation5 + $0x48] ss:$16 sps:$4 sm:$0xff]   ;;  %v966_v13 = vld [vmem:[#allocation5 + $0x64] ss:$16 sps:$4 sm:$0xff]  }
  0x5e   : > { %v968_v14 = vld [vmem:[#allocation5 + $0x6c] ss:$16 sps:$4 sm:$0xff]   ;;  %v970_v15 = vld [vmem:[#allocation5 + $0x60] ss:$16 sps:$4 sm:$0xff]   ;;  %v971_v16 = vld [vmem:[#allocation5 + $0x68] ss:$16 sps:$4 sm:$0xff]  }
  0x5f   : > { %v972_v17 = vld [vmem:[#allocation5 + $0x84] ss:$16 sps:$4 sm:$0xff]   ;;  %v974_v18 = vld [vmem:[#allocation5 + $0x8c] ss:$16 sps:$4 sm:$0xff]   ;;  %v976_v19 = vld [vmem:[#allocation5 + $0x80] ss:$16 sps:$4 sm:$0xff]  }
  0x60   : > { %462 = vmatpush1.bf16.msra.mxu0 %v958_v7  ;;  %503 = vmatpush1.bf16.msra.mxu1 %v959_v8  ;;  %v977_v20 = vld [vmem:[#allocation5 + $0x88] ss:$16 sps:$4 sm:$0xff]   ;;  %v1148_v22 = vmov 1966171168   ;;  %v978_v24 = vld [vmem:[#allocation5 + $0xa4] ss:$16 sps:$4 sm:$0xff]  }
  0x61   : > { %463 = vmatprep.subr.bf16.mxu0 %v960_v9  ;;  %504 = vmatprep.subr.bf16.mxu1 %v962_v10  ;;  %v285_v23 = vunpack.c.l.s4 %v1148_v22  ;;  %v980_v25 = vld [vmem:[#allocation5 + $0xac] ss:$16 sps:$4 sm:$0xff]   ;;  %v982_v26 = vld [vmem:[#allocation5 + $0xa0] ss:$16 sps:$4 sm:$0xff]   ;;  %v262_v27 = vshrl.u32 %v261_v21, 7  ;;  %s866_s11 = sshll.u32 %s1132_s15, 7 }
  0x62   : > { %v983_v29 = vld [vmem:[#allocation5 + $0xa8] ss:$16 sps:$4 sm:$0xff]   ;;  %v984_v30 = vld [vmem:[#allocation5 + $0xc4] ss:$16 sps:$4 sm:$0xff]   ;;  %v986_v31 = vld [vmem:[#allocation5 + $0xcc] ss:$16 sps:$4 sm:$0xff]   ;;  %s1356_s26 = scalar_lea.hbm %s1414_s3, %s866_s11 }
  0x63   : > { %v286_v28 = vunpack.c.0.s8 %v285_v23  ;;  %v225_v32 = vld [vmem:[%s1332_s7] sm:$0x1]  ;;  %v226_v33 = vld [vmem:[%s1332_s7 + $0x1] sm:$0x1]  ;;  %v988_v36 = vld [vmem:[#allocation5 + $0xc0] ss:$16 sps:$4 sm:$0xff]  }
  0x64   : > { %464 = vmatpush1.bf16.msra.mxu0 %v964_v11  ;;  %505 = vmatpush1.bf16.msra.mxu1 %v965_v12  ;;  %v283_v34 = vcombine.low %v225_v32, %v226_v33  ;;  %v989_v37 = vld [vmem:[#allocation5 + $0xc8] ss:$16 sps:$4 sm:$0xff]   ;;  %v990_v38 = vld [vmem:[#allocation5 + $0xe4] ss:$16 sps:$4 sm:$0xff]   ;;  %v992_v39 = vld [vmem:[#allocation5 + $0xec] ss:$16 sps:$4 sm:$0xff]  }
  0x65   : > { %465 = vmatprep.subr.bf16.mxu0 %v966_v13  ;;  %506 = vmatprep.subr.bf16.mxu1 %v968_v14  ;;  %v1344_v35 = vsub.s32 %v286_v28, %v262_v27  ;;  %v994_v41 = vld [vmem:[#allocation5 + $0xe0] ss:$16 sps:$4 sm:$0xff]   ;;  %v995_v42 = vld [vmem:[#allocation5 + $0xe8] ss:$16 sps:$4 sm:$0xff]   ;;  %v263_v44 = vsub.s32 0, %v262_v27  ;;  %v271_v45 = vsub.s32 2, %v262_v27 }
  0x66   : > { %v259_v46 = vld [vmem:[%s1413_s2] sm:$0xf]  ;;  %v267_v47 = vsub.s32 1, %v262_v27  ;;  %v1149_v48 = vmov 1983009808   ;;  %v275_v50 = vsub.s32 3, %v262_v27 }
  0x67   : > { %v290_v40 = vrot.slane %v283_v34, %v1344_v35  ;;  %v548_v49 = vunpack.c.l.s4 %v1149_v48  ;;  %v264_v51 = vrot.slane %v259_v46, %v263_v44  ;;  %v272_v52 = vrot.slane %v259_v46, %v271_v45  ;;  %s221_s9 = scalar_lea.vmem [#allocation7], %s815_s24  ;;  %s691_s15 = scalar_lea.sflag [#allocation4], %s1328_s4 }
  0x68   : > { %466 = vmatpush1.bf16.msra.mxu0 %v970_v15  ;;  %507 = vmatpush1.bf16.msra.mxu1 %v971_v16  ;;  %v268_v53 = vrot.slane %v259_v46, %v267_v47  ;;  %v276_v55 = vrot.slane %v259_v46, %v275_v50  ;;  %s707_s10 = sshll.u32 %s221_s9, 4  ;;  %s1150_s21 = smov [#allocation7]   ;;  %s1358_s10 = int_to_ptr.vmem [resolvable:$true] %s707_s10 }
  0x69   : > { %467 = vmatprep.subr.bf16.mxu0 %v972_v17  ;;  %508 = vmatprep.subr.bf16.mxu1 %v974_v18  ;;  %v297_v43 = vrot.slane %v290_v40, %v1344_v35  ;;  %v549_v54 = vunpack.c.0.s8 %v548_v49  ;;  %s1054_s8 = scalar_lea.vmem %s1358_s10, 128  ;;  %s1058_s30 = sshll.u32 %s1150_s21, 4  ;;  %s1059_s30 = int_to_ptr.vmem [resolvable:$false] %s1058_s30 }
  0x6a   : > { %p1055_p4 = scmp.ne.s32.totalorder %s1358_s10, %s1054_s8  ;;  %s1060_s25 = scalar_lea.vmem %s1059_s30, 256 }
  0x6b   : > { %v552_v63 = vsub.s32 %v549_v54, %v262_v27  ;;  %p1061_p12 = scmp.lt.s32.totalorder %s1358_s10, %s1059_s30  ;;  %p1062_p11 = scmp.lt.s32.totalorder %s1060_s25, %s1054_s8 }
  0x6c   : > { %468 = vmatpush1.bf16.msra.mxu0 %v976_v19  ;;  %509 = vmatpush1.bf16.msra.mxu1 %v977_v20  ;;  %p1056_p6 = pnand %p1055_p4, %p1270_p10 }
  0x6d   : > { %469 = vmatprep.subr.bf16.mxu0 %v978_v24  ;;  %510 = vmatprep.subr.bf16.mxu1 %v980_v25  ;;  %p1063_p0 = por %p1062_p11, %p1061_p12 }
  0x6e   : > { %p1057_p8 = pneg %p1056_p6 }
  0x70   : > { %470 = vmatpush1.bf16.msra.mxu0 %v982_v26  ;;  %511 = vmatpush1.bf16.msra.mxu1 %v983_v29  ;;  %p1064_p5 = pnand %p1063_p0, %p1057_p8 }
  0x71   : > { %471 = vmatprep.subr.bf16.mxu0 %v984_v30  ;;  %512 = vmatprep.subr.bf16.mxu1 %v986_v31 }
  0x74   : > { %472 = vmatpush1.bf16.msra.mxu0 %v988_v36  ;;  %513 = vmatpush1.bf16.msra.mxu1 %v989_v37 }
  0x75   : > { %473 = vmatprep.subr.bf16.mxu0 %v990_v38  ;;  %514 = vmatprep.subr.bf16.mxu1 %v992_v39 }
  0x78   : > { %474 = vmatpush1.bf16.msra.mxu0 %v994_v41  ;;  %515 = vmatpush1.bf16.msra.mxu1 %v995_v42 }
  0x7b   : > { %492 = vmatmul.mubr.bf16.vlgmr.msra.gmra.mrb[0].mxu0 %v297_v43  ;;  %533 = vmatmul.mubr.bf16.vlgmr.msra.gmra.mrb[0].mxu1 %v297_v43 }
 0x14e   : > { %v493_v56 = vpop.f32.mrb[0].mxu0  ;;  %v534_v57 = vpop.f32.mrb[0].mxu1 }
 0x14f   : > { %v494_v58 = vadd.f32 %v493_v56, %v264_v51  ;;  %v535_v59 = vadd.f32 %v534_v57, %v272_v52  ;;  %v495_v60 = vpop.f32.mrb[1].mxu0  ;;  %v536_v61 = vpop.f32.mrb[1].mxu1 }
 0x150   : > { %v496_v62 = vadd.f32 %v495_v60, %v268_v53  ;;  %v537_v0 = vadd.f32 %v536_v61, %v276_v55  ;;  %v497_v1 = vpop.f32.mrb[2].mxu0  ;;  %v538_v2 = vpop.f32.mrb[2].mxu1 }
 0x151   : > { %v498_v3 = vpop.f32.mrb[3].mxu0  ;;  %v539_v4 = vpop.f32.mrb[3].mxu1 }
 0x152   : > { %v545_v5 = vcombine.low %v494_v58, %v496_v62  ;;  %v546_v6 = vcombine.low %v535_v59, %v537_v0 }
 0x154   : > { %v553_v7 = vrot.slane %v545_v5, %v552_v63  ;;  %v560_v8 = vrot.slane %v546_v6, %v552_v63 }
 0x156   : > { %v561_v9 = vcombine.low %v553_v7, %v560_v8  ;;  %v562_v10 = vcombine.high %v553_v7, %v560_v8  ;;  %v852_v11 = vcombine.low %v560_v8, %v560_v8  ;;  %v853_v12 = vcombine.high %v560_v8, %v560_v8 }
 0x158   : > { %v569_v13 = vrot.slane %v561_v9, %v552_v63  ;;  %v577_v14 = vrot.slane %v562_v10, %v552_v63  ;;  %v632_v15 = vrot.slane %v852_v11, %v552_v63  ;;  %v641_v16 = vrot.slane %v853_v12, %v552_v63 }
 0x15a   : > { %v570_v17 = vcombine.high %v569_v13, %v569_v13  ;;  %v578_v18 = vcombine.high %v577_v14, %v577_v14  ;;  %v633_v19 = vcombine.high %v632_v15, %v632_v15  ;;  %v642_v20 = vcombine.high %v641_v16, %v641_v16 }
 0x15c   : > { %v848_v21 = vpack.c.bf16 %v570_v17, %v569_v13  ;;  %v849_v22 = vpack.c.bf16 %v578_v18, %v577_v14  ;;  %v854_v23 = vpack.c.bf16 %v633_v19, %v632_v15  ;;  %v855_v24 = vpack.c.bf16 %v642_v20, %v641_v16 }
 0x15e   : > { %v598_v25 = vrot.slane %v848_v21, %v1344_v35  ;;  %v613_v26 = vrot.slane %v849_v22, %v1344_v35  ;;  %v662_v27 = vrot.slane %v854_v23, %v1344_v35  ;;  %v677_v28 = vrot.slane %v855_v24, %v1344_v35 }
 0x160   : > { %850 = vst.sshfl [vmem:[%s221_s9] sm:$0x5 pattern:$0x73625140] %v598_v25 }
 0x161   : > { %851 = vst.sshfl [vmem:[%s221_s9 + $0x4] sm:$0x5 pattern:$0x73625140] %v613_v26 }
 0x162   : > { %864 = vst.sshfl [vmem:[%s221_s9 + $0x2] sm:$0x5 pattern:$0x73625140] %v662_v27 }
 0x163   : > { %865 = vst.sshfl [vmem:[%s221_s9 + $0x6] sm:$0x5 pattern:$0x73625140] %v677_v28 }
 0x164   : > { %1067 = shalt.err (!%p1064_p5)
}
 0x165   : > { %s1068_s29 = scalar_lea.hbm %s1356_s26, 128  ;;  %s1072_s20 = scalar_lea.hbm %s1414_s3, 256 }
 0x166   : > { %p1069_p9 = scmp.ne.s32.totalorder %s1356_s26, %s1068_s29  ;;  %p1073_p3 = scmp.lt.u32.totalorder %s1356_s26, %s1414_s3 }
 0x167   : > { %p1074_p7 = scmp.lt.u32.totalorder %s1072_s20, %s1068_s29  ;;  %p1076_p4 = scmp.lt.u32.totalorder %s1068_s29, %s1356_s26 }
 0x168   : > { %p1070_p1 = pnand %p1069_p9, %p1270_p10 }
 0x169   : > { %p1075_p13 = por %p1074_p7, %p1073_p3 }
 0x16a   : > { %p1071_p2 = pneg %p1070_p1 }
 0x16b   : > { %p1077_p6 = por %p1076_p4, %p1075_p13 }
 0x16d   : > { %p1078_p8 = pnand %p1077_p6, %p1071_p2 }
 0x16f   : > { %1081 = shalt.err (!%p1078_p8)
}
 0x170   : > { %s1151_s11 = smov 32   ;;  %s1152_s9 = smov 2  }
 0x171   : > { %873 = dma.vmem_to_hbm [thread:$0]  (%p1270_p10), %s1358_s10, 128, %s1356_s26, %s691_s15, %s1151_s11, %s1151_s11, %s1152_s9  }
 0x172 PF: > { %s722_s18 = sand.u32 1, %s1120_s12   ;;  %p1432_p12 = scmp.ne.s32.totalorder %s1422_s23, 0 }
 0x173   : > { %p1433_p11 = scmp.ge.s32.totalorder %s1140_s17, 2  ;;  %s723_s19 = scalar_lea.sflag [#allocation4], %s722_s18 }
 0x175   : > { %p884_p0 = pnand %p1433_p11, %p1432_p12 }
 0x177   : > { %1115 = dma.done.wait (!%p884_p0), %s723_s19, 128  }
 0x178   : > { %1117 = vsyncadd (!%p884_p0), %s723_s19, 4294967168  ;;  %s20_s17 = sadd.s32 1, %s1140_s17   ;;  %s1434_s12 = smov %s1124_s13 }
 0x179   : > { %p17_p5 = scmp.ge.s32.totalorder %s20_s17, 4   ;;  %s1435_s13 = smov %s1128_s14 }
 0x17a   : > { %s1436_s14 = smov %s1279_s5  ;;  %s1437_s15 = smov %s1136_s16 }
 0x17b   : > { %s1438_s16 = smov %s1440_s28  ;;  %19 = sbr.rel (!%p17_p5) target bundleno = 7 (0x7), region = 82 }
 0x182   :  { %728 = vsyncpa [#allocation3], 1 }
 0x183   :  { %730 = vsyncpa [#allocation3 + $0x1], 1 }
 0x184   :  { %731 = vsyncpa [#allocation6], 1 }
 0x185   :  { %732 = vsyncpa [#allocation4], 1 }
 0x186   :  { %734 = vsyncpa [#allocation4 + $0x1], 1 }

</bundles_post_ra>
